<compile_context>
chip_gen: v6e
topology: v6e:2x2x1
jax: 0.10.0
libtpu: 0.0.40
codegen_flags: <defaults>
</compile_context>

<pallas_src>
from functools import partial

import jax
import jax.numpy as jnp
from jax.experimental import pallas as pl
from jax.experimental.pallas import tpu as pltpu

_LANE = 128     # lane width (last dim of a vreg)
_SUBLANE = 8    # sublane count (second-to-last dim of a vreg)


def mlp_kernel(x_ref, w1_ref, b1_ref, w2_ref, b2_ref, o_ref):
    # fc1: (B, S) @ (S, H) + (1, H), ReLU   -- all in vregs, nothing stored.
    h = jnp.dot(x_ref[...], w1_ref[...], preferred_element_type=jnp.float32)
    h = jnp.maximum(h + b1_ref[...], 0.0)
    # fc2: (B, H) @ (H, Ap) + (1, Ap)   (Ap = action dim padded to 128 lanes)
    out = jnp.dot(h, w2_ref[...], preferred_element_type=jnp.float32)
    o_ref[...] = (out + b2_ref[...]).astype(o_ref.dtype)


def _round_up(n, m):
    return ((n + m - 1) // m) * m


@jax.jit
def network_forward(x, w1, b1, w2, b2):
    """x: (B, state_size) f32; returns (B, action_size) f32."""
    B, S = x.shape
    H = w1.shape[1]
    A = w2.shape[1]

    # Pad batch to a sublane multiple and the output features to a full lane
    # width so the kernel's final store is lane-dense (unmasked vst).
    Bp = _round_up(max(B, _SUBLANE), _SUBLANE)
    Ap = _round_up(max(A, _LANE), _LANE)

    x_p = x if Bp == B else jnp.pad(x, ((0, Bp - B), (0, 0)))
    w2_p = w2 if Ap == A else jnp.pad(w2, ((0, 0), (0, Ap - A)))
    b2_p = b2 if Ap == A else jnp.pad(b2, ((0, 0), (0, Ap - A)))

    flops = 2 * Bp * (S * H + H * Ap)
    bytes_accessed = 4 * (Bp * S + S * H + H + H * Ap + Ap + Bp * Ap)

    vmem_spec = pl.BlockSpec(memory_space=pltpu.MemorySpace.VMEM)

    out_padded = pl.pallas_call(
        mlp_kernel,
        out_shape=jax.ShapeDtypeStruct((Bp, Ap), jnp.float32),
        in_specs=[vmem_spec, vmem_spec, vmem_spec, vmem_spec, vmem_spec],
        out_specs=vmem_spec,
        cost_estimate=pl.CostEstimate(
            flops=flops, transcendentals=0, bytes_accessed=bytes_accessed
        ),
    )(x_p, w1, b1, w2_p, b2_p)

    # Slice back to the logical (B, action_size) result.
    return out_padded[:B, :A]


def init_params(key, state_size, hidden, action_size):
    """Deterministic init mimicking nn.Linear's U(-1/sqrt(fan_in), 1/sqrt(fan_in))."""
    k1, k2, k3, k4 = jax.random.split(key, 4)
    bound1 = 1.0 / jnp.sqrt(state_size)
    bound2 = 1.0 / jnp.sqrt(hidden)
    # stored as (in, out) == PyTorch weight.T
    w1 = jax.random.uniform(k1, (state_size, hidden), jnp.float32, -bound1, bound1)
    b1 = jax.random.uniform(k2, (1, hidden), jnp.float32, -bound1, bound1)
    w2 = jax.random.uniform(k3, (hidden, action_size), jnp.float32, -bound2, bound2)
    b2 = jax.random.uniform(k4, (1, action_size), jnp.float32, -bound2, bound2)
    return w1, b1, w2, b2


if __name__ == "__main__":
    # FrozenLake-v1: observation_space.n = 16 states, 4 actions.
    state_size, hidden, action_size = 16, 64, 4
    batch = 8

    key = jax.random.PRNGKey(0)
    k_params, k_x = jax.random.split(key)
    w1, b1, w2, b2 = init_params(k_params, state_size, hidden, action_size)

    # Example input: a batch of (e.g. one-hot-like) state vectors.
    x = jax.random.normal(k_x, (batch, state_size), jnp.float32)

    out = network_forward(x, w1, b1, w2, b2)
    out = jax.block_until_ready(out)

    # Reference check in plain JAX (same math as the PyTorch forward).
    ref = jnp.maximum(x @ w1 + b1, 0.0) @ w2 + b2
    assert out.shape == (batch, action_size)
    assert jnp.allclose(out, ref, atol=1e-5, rtol=1e-5)

    # Also exercise a non-multiple-of-8 batch (padding path).
    x_odd = jax.random.normal(jax.random.PRNGKey(1), (5, state_size), jnp.float32)
    out_odd = jax.block_until_ready(network_forward(x_odd, w1, b1, w2, b2))
    ref_odd = jnp.maximum(x_odd @ w1 + b1, 0.0) @ w2 + b2
    assert out_odd.shape == (5, action_size)
    assert jnp.allclose(out_odd, ref_odd, atol=1e-5, rtol=1e-5)

    print("KERNEL_OK")
</pallas_src>

<mosaic_0001>
module attributes {stable_mosaic.version = 11 : i64} {
  func.func @mlp_kernel(%arg0: memref<8x16xf32, #tpu.memory_space<vmem>>, %arg1: memref<16x64xf32, #tpu.memory_space<vmem>>, %arg2: memref<1x64xf32, #tpu.memory_space<vmem>>, %arg3: memref<64x128xf32, #tpu.memory_space<vmem>>, %arg4: memref<1x128xf32, #tpu.memory_space<vmem>>, %arg5: memref<8x128xf32, #tpu.memory_space<vmem>>) attributes {dimension_semantics = [], scalar_prefetch = 0 : i64, scratch_operands = 0 : i64, tpu.core_type = #tpu.core_type<tc>} {
    %c0 = arith.constant 0 : index
    %c0_0 = arith.constant 0 : index
    %0 = vector.load %arg0[%c0, %c0_0] : memref<8x16xf32, #tpu.memory_space<vmem>>, vector<8x16xf32>
    %c0_1 = arith.constant 0 : index
    %c0_2 = arith.constant 0 : index
    %1 = vector.load %arg1[%c0_1, %c0_2] : memref<16x64xf32, #tpu.memory_space<vmem>>, vector<16x64xf32>
    %cst = arith.constant dense<0.000000e+00> : vector<8x64xf32>
    %2 = tpu.matmul %0, %1, %cst {dimension_numbers = #tpu.dot_dimension_numbers<[1], [0], [0], [1], [0, 0, 1, 1], [], []>} : vector<8x16xf32>, vector<16x64xf32>, vector<8x64xf32> -> vector<8x64xf32>
    %c0_3 = arith.constant 0 : index
    %c0_4 = arith.constant 0 : index
    %3 = vector.load %arg2[%c0_3, %c0_4] : memref<1x64xf32, #tpu.memory_space<vmem>>, vector<1x64xf32>
    %4 = vector.broadcast %3 : vector<1x64xf32> to vector<8x64xf32>
    %5 = arith.addf %2, %4 : vector<8x64xf32>
    %cst_5 = arith.constant 0.000000e+00 : f32
    %6 = vector.broadcast %cst_5 : f32 to vector<8x64xf32>
    %7 = arith.maximumf %5, %6 : vector<8x64xf32>
    %c0_6 = arith.constant 0 : index
    %c0_7 = arith.constant 0 : index
    %8 = vector.load %arg3[%c0_6, %c0_7] : memref<64x128xf32, #tpu.memory_space<vmem>>, vector<64x128xf32>
    %cst_8 = arith.constant dense<0.000000e+00> : vector<8x128xf32>
    %9 = tpu.matmul %7, %8, %cst_8 {dimension_numbers = #tpu.dot_dimension_numbers<[1], [0], [0], [1], [0, 0, 1, 1], [], []>} : vector<8x64xf32>, vector<64x128xf32>, vector<8x128xf32> -> vector<8x128xf32>
    %c0_9 = arith.constant 0 : index
    %c0_10 = arith.constant 0 : index
    %10 = vector.load %arg4[%c0_9, %c0_10] : memref<1x128xf32, #tpu.memory_space<vmem>>, vector<1x128xf32>
    %11 = vector.broadcast %10 : vector<1x128xf32> to vector<8x128xf32>
    %12 = arith.addf %9, %11 : vector<8x128xf32>
    %c0_11 = arith.constant 0 : index
    %c0_12 = arith.constant 0 : index
    %13 = vector.load %arg5[%c0_11, %c0_12] : memref<8x128xf32, #tpu.memory_space<vmem>>, vector<8x128xf32>
    tpu.vector_store %arg5[%c0_11, %c0_12], %12 {strides = array<i32>} : memref<8x128xf32, #tpu.memory_space<vmem>>, vector<8x128xf32>,
    return
  }
}

</mosaic_0001>

<bundles_post_ra>
// kernel: network_forward.1
= control target key start
LH: loop header
LB: loop body
LE: loop exit
PB: predicated region body
PF: predicated region fallthrough
CT: control target
= control target key end

     0   :  { %v243_v0 = vmov 0.0   ;;  %vm244_vm0 = vmmov 0   ;;  %vm30_vm1 = vcmask 130048   ;;  %vm120_vm2 = vcmask 523264   ;;  %s319_s1 = inlined_call_operand.vmem [shape: f32[16,64], index: 1, kind: input, shape index: {}]   ;;  %s320_s0 = inlined_call_operand.vmem [shape: f32[8,16], index: 0, kind: input, shape index: {}]   ;;  %s321_s3 = inlined_call_operand.vmem [shape: f32[64,128], index: 3, kind: input, shape index: {}]   ;;  %s322_s2 = inlined_call_operand.vmem [shape: f32[1,64], index: 2, kind: input, shape index: {}]   ;;  %s323_s4 = inlined_call_operand.vmem [shape: f32[1,128], index: 4, kind: input, shape index: {}]   ;;  %s324_s5 = inlined_call_operand.vmem [shape: f32[8,128], index: 5, kind: output, shape index: {}]  }
   0x1   :  { %215 = vmatprep.subr.mxu0 %v243_v0  ;;  %v22_v1 = vld [vmem:[%s319_s1 + $0x8] sm:$0xff]  ;;  %v21_v2 = vld [vmem:[%s319_s1] sm:$0xff]  ;;  %219 = vmatprep.mubr.msk.f32.mxu0 %vm244_vm0, %v243_v0  ;;  %v112_v4 = vld [vmem:[%s321_s3 + $0x38] sm:$0xff] }
   0x2   :  { %216 = vmatpush3.msra.mxu0 %v22_v1  ;;  %v20_v3 = vld [vmem:[%s320_s0] sm:$0xff]  ;;  %222 = vmatprep.subr.mxu1 %v243_v0  ;;  %v111_v5 = vld [vmem:[%s321_s3 + $0x30] sm:$0xff]  ;;  %v110_v6 = vld [vmem:[%s321_s3 + $0x28] sm:$0xff] }
   0x3   :  { %217 = vmatprep.subr.mxu0 %v243_v0  ;;  %223 = vmatpush3.msra.mxu1 %v112_v4  ;;  %v109_v7 = vld [vmem:[%s321_s3 + $0x20] sm:$0xff]  ;;  %v108_v8 = vld [vmem:[%s321_s3 + $0x18] sm:$0xff]  ;;  %v107_v9 = vld [vmem:[%s321_s3 + $0x10] sm:$0xff] }
   0x4   :  { %218 = vmatpush3.msra.mxu0 %v21_v2  ;;  %224 = vmatprep.subr.mxu1 %v243_v0  ;;  %v106_v10 = vld [vmem:[%s321_s3 + $0x8] sm:$0xff]  ;;  %v105_v11 = vld [vmem:[%s321_s3] sm:$0xff] }
   0x5   :  { %220 = vmatmul.mubr.msk.f32.vlgmr.msra.gmra.mxu0 %vm30_vm1, %v20_v3  ;;  %225 = vmatpush3.msra.mxu1 %v111_v5  ;;  %v199_v12 = vld [vmem:[%s322_s2] ss:$0 sm:$0xff] }
   0x6   :  { %226 = vmatprep.subr.mxu1 %v243_v0  ;;  %238 = vmatprep.mubr.msk.f32.mxu1 %vm244_vm0, %v243_v0  ;;  %v201_v17 = vld [vmem:[%s323_s4] ss:$0 sm:$0xff] }
   0x7   :  { %227 = vmatpush3.msra.mxu1 %v110_v6 }
   0x8   :  { %228 = vmatprep.subr.mxu1 %v243_v0 }
   0x9   :  { %229 = vmatpush3.msra.mxu1 %v109_v7 }
   0xa   :  { %230 = vmatprep.subr.mxu1 %v243_v0 }
   0xb   :  { %231 = vmatpush3.msra.mxu1 %v108_v8 }
   0xc   :  { %232 = vmatprep.subr.mxu1 %v243_v0 }
   0xd   :  { %233 = vmatpush3.msra.mxu1 %v107_v9 }
   0xe   :  { %234 = vmatprep.subr.mxu1 %v243_v0 }
   0xf   :  { %235 = vmatpush3.msra.mxu1 %v106_v10 }
  0x10   :  { %236 = vmatprep.subr.mxu1 %v243_v0 }
  0x11   :  { %237 = vmatpush3.msra.mxu1 %v105_v11 }
  0xc5   :  { %v100_v13 = vpop.f32.mrf.mxu0 }
  0xc6   :  { %v101_v14 = vadd.f32 %v199_v12, %v100_v13 }
  0xc7   :  { %v221_v15 = vpop.f32.mrf.mxu0 }
  0xc8   :  { %v104_v16 = vmax.f32 %v101_v14, 0.0 }
  0xca   :  { %239 = vmatmul.mubr.msk.f32.vlgmr.msra.gmra.mxu1 %vm120_vm2, %v104_v16 }
 0x18a   :  { %v190_v18 = vpop.f32.mrf.mxu1 }
 0x18b   :  { %v191_v19 = vadd.f32 %v201_v17, %v190_v18 }
 0x18c   :  { %v240_v20 = vpop.f32.mrf.mxu1 }
 0x18d   :  { %194 = vst [vmem:[%s324_s5] sm:$0xff] %v191_v19 }

</bundles_post_ra>
